<compile_context>
chip_gen: v7x
topology: tpu7x:2x2x1
jax: 0.10.0
libtpu: 0.0.40
codegen_flags: <defaults>
</compile_context>

<pallas_src>
import numpy as np
import jax
import jax.numpy as jnp
from jax import lax
from jax.experimental import pallas as pl
from jax.experimental.pallas import tpu as pltpu


def delayed_fm(layer, delay):
    # TODO(synk): `delayed_fm` is not defined in the provided source; use max(0, layer - delay).
    return max(0, layer - delay)


# ------------------------- interpolation-matrix construction -------------------------

def _bilinear_matrix_np(in_size: int, scale: int) -> np.ndarray:
    """Dense (out, in) matrix reproducing F.interpolate(mode='bilinear', align_corners=False)."""
    out_size = in_size * scale
    j = np.arange(out_size, dtype=np.float64)
    src = (j + 0.5) / scale - 0.5
    src = np.clip(src, 0.0, None)
    x0 = np.minimum(np.floor(src).astype(np.int64), in_size - 1)
    x1 = np.minimum(x0 + 1, in_size - 1)
    w1 = (src - x0).astype(np.float32)
    w0 = (1.0 - w1).astype(np.float32)
    m = np.zeros((out_size, in_size), dtype=np.float32)
    np.add.at(m, (np.arange(out_size), x0), w0)
    np.add.at(m, (np.arange(out_size), x1), w1)
    return m


def _axis_matrix(in_size: int, first_crop: int, second_crop: int, scale: int) -> np.ndarray:
    """(out, in_size) matrix composing center-crop(first_crop) -> bilinear x scale -> center-crop(second_crop)."""
    half = in_size // 2
    up = _bilinear_matrix_np(2 * first_crop, scale)            # (2*fc*scale, 2*fc)
    a = np.zeros((up.shape[0], in_size), dtype=np.float32)
    a[:, half - first_crop:half + first_crop] = up             # fold first_crop (zero columns elsewhere)
    if second_crop:
        c = a.shape[0] // 2
        a = a[c - second_crop:c + second_crop, :]               # fold second_crop (keep surviving rows)
    return a


# ------------------------- fused Pallas kernels -------------------------

def _make_reduce_kernel(num_sides):
    """Fused per-batch kernel: 1x1 conv over [x_main | upsampled sides] + bias + ReLU.

    refs = (x_main, side_0..side_{ns-1}, K_0..K_{ns-1}, W_split, bias, out)
      x_main : (1, C, H*W)            side_a : (1, C, Hs_a*Ws_a)
      K_a    : (H*W, Hs_a*Ws_a)       W_split: (num_arms, Cout, C)   bias: (Cout, 1)
      out    : (1, Cout, H*W)
    """
    def kernel(*refs):
        xm_ref = refs[0]
        side_refs = refs[1:1 + num_sides]
        k_refs = refs[1 + num_sides:1 + 2 * num_sides]
        w_ref = refs[1 + 2 * num_sides]
        b_ref = refs[2 + 2 * num_sides]
        o_ref = refs[3 + 2 * num_sides]

        xm = xm_ref[0].astype(jnp.float32)                       # (C, HW)
        acc = jnp.dot(w_ref[0].astype(jnp.float32), xm,
                      preferred_element_type=jnp.float32)        # (Cout, HW)
        for a in range(num_sides):
            xs = side_refs[a][0].astype(jnp.float32)             # (C, HWs)
            # channel mixing first (keeps the big matmul at Cout rows) ...
            z = jnp.dot(w_ref[a + 1].astype(jnp.float32), xs,
                        preferred_element_type=jnp.float32)      # (Cout, HWs)
            # ... then crop+bilinear-upsample via the folded spatial matrix (contract K=HWs)
            acc = acc + lax.dot_general(z, k_refs[a][...],
                                        (((1,), (1,)), ((), ())),
                                        preferred_element_type=jnp.float32)   # (Cout, HW)
        y = acc + b_ref[...].astype(jnp.float32)
        o_ref[0] = jnp.maximum(y, 0.0).astype(o_ref.dtype)
    return kernel


def _make_concat_kernel(num_sides):
    """Fused per-batch kernel for reduce=False: writes [x_main | upsampled sides] directly."""
    def kernel(*refs):
        xm_ref = refs[0]
        side_refs = refs[1:1 + num_sides]
        k_refs = refs[1 + num_sides:1 + 2 * num_sides]
        o_ref = refs[1 + 2 * num_sides]

        parts = [xm_ref[0].astype(o_ref.dtype)]
        for a in range(num_sides):
            xs = side_refs[a][0].astype(jnp.float32)             # (C, HWs)
            up = lax.dot_general(xs, k_refs[a][...],
                                 (((1,), (1,)), ((), ())),
                                 preferred_element_type=jnp.float32)          # (C, HW)
            parts.append(up.astype(o_ref.dtype))
        o_ref[0] = jnp.concatenate(parts, axis=0)                # (num_arms*C, HW)
    return kernel


# ------------------------- module port -------------------------

class MultiScaleMergeBlock:
    def __init__(self, layer_num, base_fm, fm_delay, act, norm, scale_side,
                 scale_main=1, base_main=512, key=None):
        # TODO(synk): ConvNormAct's `act`/`norm` are constructor-chosen in the original;
        # norm=Identity and act=ReLU are assumed here.
        base_main = int(base_main * (1 / 2) ** (layer_num + 1))
        num_arms = len(scale_side) + 1
        self.num_arms = num_arms
        self.scale_factor = [ss // scale_main for ss in scale_side]
        self.first_crop = [max(1, base_main // ss // 2) for ss in scale_side]
        self.second_crop = [0] * (num_arms - 1)
        for layer, ss in enumerate(scale_side):
            if base_main <= ss:
                self.second_crop[layer] = int(base_main // 2)
        in_channels = base_fm * 2 ** delayed_fm(layer_num + 1, fm_delay)
        self.in_channels = in_channels
        cin, cout = num_arms * in_channels, in_channels

        # Deterministic init: zeros, identity block, Gaussian jitter (std 1e-4).
        w = np.zeros((cout, cin), np.float32)
        w[:in_channels, :in_channels] = np.eye(in_channels, dtype=np.float32)
        b = np.zeros((cout,), np.float32)
        if key is None:
            key = jax.random.PRNGKey(0)
        k1, k2 = jax.random.split(key)
        eps = 0.0001
        self.weight = jnp.asarray(w) + eps * jax.random.normal(k1, (cout, cin), jnp.float32)
        self.bias = jnp.asarray(b) + eps * jax.random.normal(k2, (cout,), jnp.float32)
        # Per-arm weight slices (num_arms, Cout, C) so the kernel indexes w_ref[arm] directly.
        self.weight_split = jnp.transpose(
            self.weight.reshape(cout, num_arms, in_channels), (1, 0, 2))
        self.bias_col = self.bias.reshape(cout, 1)
        self._k_cache = {}

    def _arm_matrix(self, side_h, side_w, fc, sc, sf):
        cache_key = (side_h, side_w, fc, sc, sf)
        if cache_key not in self._k_cache:
            ah = _axis_matrix(side_h, fc, sc, sf)                # (Ho, side_h)
            aw = _axis_matrix(side_w, fc, sc, sf)                # (Wo, side_w)
            k = jnp.asarray(np.kron(ah, aw))                     # (Ho*Wo, side_h*side_w)
            self._k_cache[cache_key] = (k, ah.shape[0], aw.shape[0])
        return self._k_cache[cache_key]

    def __call__(self, *inputs, reduce=True):
        x_main = inputs[0]
        sides = list(inputs[1:])
        N, C, H, W = x_main.shape
        assert C == self.in_channels

        ks = []
        for x_side, fc, sc, sf in zip(sides, self.first_crop, self.second_crop,
                                      self.scale_factor):
            k, ho, wo = self._arm_matrix(x_side.shape[-2], x_side.shape[-1], fc, sc, sf)
            assert (ho, wo) == (H, W), "side-arm output must match x_main spatial size"
            ks.append(k)

        ns = len(sides)
        xm_flat = x_main.reshape(N, C, H * W)                                   # free reshape
        side_flats = [s.reshape(N, C, s.shape[-2] * s.shape[-1]) for s in sides]

        main_spec = pl.BlockSpec((1, C, H * W), lambda n: (n, 0, 0))
        side_specs = [pl.BlockSpec((1, C, sfl.shape[-1]), lambda n: (n, 0, 0))
                      for sfl in side_flats]
        k_specs = [pl.BlockSpec(k.shape, lambda n: (0, 0)) for k in ks]

        if reduce:
            cout = self.weight.shape[0]
            out = pl.pallas_call(
                _make_reduce_kernel(ns),
                out_shape=jax.ShapeDtypeStruct((N, cout, H * W), x_main.dtype),
                grid=(N,),
                in_specs=([main_spec] + side_specs + k_specs
                          + [pl.BlockSpec(self.weight_split.shape, lambda n: (0, 0, 0)),
                             pl.BlockSpec(self.bias_col.shape, lambda n: (0, 0))]),
                out_specs=pl.BlockSpec((1, cout, H * W), lambda n: (n, 0, 0)),
                compiler_params=pltpu.CompilerParams(dimension_semantics=("parallel",)),
            )(xm_flat, *side_flats, *ks, self.weight_split, self.bias_col)
            return out.reshape(N, cout, H, W)
        else:
            ctot = (ns + 1) * C
            out = pl.pallas_call(
                _make_concat_kernel(ns),
                out_shape=jax.ShapeDtypeStruct((N, ctot, H * W), x_main.dtype),
                grid=(N,),
                in_specs=[main_spec] + side_specs + k_specs,
                out_specs=pl.BlockSpec((1, ctot, H * W), lambda n: (n, 0, 0)),
                compiler_params=pltpu.CompilerParams(dimension_semantics=("parallel",)),
            )(xm_flat, *side_flats, *ks)
            return out.reshape(N, ctot, H, W)


# ------------------------- pure-JAX reference for verification -------------------------

def reference_forward(block, inputs, reduce=True):
    x_main = inputs[0]
    for x_side, fc, sc, sf in zip(inputs[1:], block.first_crop, block.second_crop,
                                  block.scale_factor):
        H, W = x_side.shape[-2], x_side.shape[-1]
        hh, hw = H // 2, W // 2
        x_side = x_side[..., hh - fc:hh + fc, hw - fc:hw + fc]
        wh = jnp.asarray(_bilinear_matrix_np(x_side.shape[-2], sf))
        ww = jnp.asarray(_bilinear_matrix_np(x_side.shape[-1], sf))
        x_side = jnp.einsum('uh,nchw,vw->ncuv', wh, x_side, ww)
        if sc:
            H2, W2 = x_side.shape[-2], x_side.shape[-1]
            hh2, hw2 = H2 // 2, W2 // 2
            x_side = x_side[..., hh2 - sc:hh2 + sc, hw2 - sc:hw2 + sc]
        x_main = jnp.concatenate((x_main, x_side), axis=1)
    if reduce:
        y = jnp.einsum('nchw,oc->nohw', x_main, block.weight) \
            + block.bias[None, :, None, None]
        x_main = jnp.maximum(y, 0.0)
    return x_main


if __name__ == "__main__":
    key = jax.random.PRNGKey(0)
    kp, k0, k1, k2 = jax.random.split(key, 4)

    # layer_num=4, base_main=512 -> effective base_main = 16 (x_main spatial size)
    # base_fm=4, fm_delay=4 -> in_channels = 8; scale_side=[2,4] -> num_arms = 3
    block = MultiScaleMergeBlock(layer_num=4, base_fm=4, fm_delay=4,
                                 act="relu", norm=None,
                                 scale_side=[2, 4], scale_main=1, base_main=512,
                                 key=kp)

    x_main = jax.random.normal(k0, (2, 8, 16, 16), jnp.float32)
    x_side_2x = jax.random.normal(k1, (2, 8, 16, 16), jnp.float32)
    x_side_4x = jax.random.normal(k2, (2, 8, 16, 16), jnp.float32)

    # reduce=True path (fully fused: crops + upsample + concat + 1x1 conv + ReLU)
    out = block(x_main, x_side_2x, x_side_4x, reduce=True)
    out = jax.block_until_ready(out)
    ref = reference_forward(block, (x_main, x_side_2x, x_side_4x), reduce=True)
    assert out.shape == (2, 8, 16, 16), out.shape
    np.testing.assert_allclose(np.asarray(out), np.asarray(ref), rtol=1e-4, atol=1e-4)

    # reduce=False path (fused crops + upsample + concat)
    out_cat = block(x_main, x_side_2x, x_side_4x, reduce=False)
    out_cat = jax.block_until_ready(out_cat)
    ref_cat = reference_forward(block, (x_main, x_side_2x, x_side_4x), reduce=False)
    assert out_cat.shape == (2, 24, 16, 16), out_cat.shape
    np.testing.assert_allclose(np.asarray(out_cat), np.asarray(ref_cat), rtol=1e-4, atol=1e-4)

    print("KERNEL_OK")
</pallas_src>

<mosaic_0001>
module attributes {stable_mosaic.version = 11 : i64} {
  func.func @kernel(%arg0: i32, %arg1: memref<1x8x256xf32, #tpu.memory_space<vmem>>, %arg2: memref<1x8x256xf32, #tpu.memory_space<vmem>>, %arg3: memref<1x8x256xf32, #tpu.memory_space<vmem>>, %arg4: memref<256x256xf32, #tpu.memory_space<vmem>>, %arg5: memref<256x256xf32, #tpu.memory_space<vmem>>, %arg6: memref<3x8x8xf32, #tpu.memory_space<vmem>>, %arg7: memref<8x1xf32, #tpu.memory_space<vmem>>, %arg8: memref<1x8x256xf32, #tpu.memory_space<vmem>>) attributes {dimension_semantics = [#tpu.dimension_semantics<parallel>], iteration_bounds = array<i64: 2>, scalar_prefetch = 0 : i64, scratch_operands = 0 : i64, tpu.core_type = #tpu.core_type<tc>, window_params = [{transform_indices = @transform_0, window_bounds = array<i64: 1, 8, 256>}, {transform_indices = @transform_1, window_bounds = array<i64: 1, 8, 256>}, {transform_indices = @transform_2, window_bounds = array<i64: 1, 8, 256>}, {pipeline_mode = #tpu.pipeline_mode<synchronous>, transform_indices = @transform_3, window_bounds = array<i64: 256, 256>}, {pipeline_mode = #tpu.pipeline_mode<synchronous>, transform_indices = @transform_4, window_bounds = array<i64: 256, 256>}, {pipeline_mode = #tpu.pipeline_mode<synchronous>, transform_indices = @transform_5, window_bounds = array<i64: 3, 8, 8>}, {pipeline_mode = #tpu.pipeline_mode<synchronous>, transform_indices = @transform_6, window_bounds = array<i64: 8, 1>}, {transform_indices = @transform_7, window_bounds = array<i64: 1, 8, 256>}]} {
    %c0 = arith.constant 0 : index
    %c0_0 = arith.constant 0 : index
    %c0_1 = arith.constant 0 : index
    %0 = vector.load %arg1[%c0, %c0_0, %c0_1] : memref<1x8x256xf32, #tpu.memory_space<vmem>>, vector<1x8x256xf32>
    %1 = vector.shape_cast %0 : vector<1x8x256xf32> to vector<8x256xf32>
    %c0_2 = arith.constant 0 : index
    %c0_3 = arith.constant 0 : index
    %c0_4 = arith.constant 0 : index
    %2 = vector.load %arg6[%c0_2, %c0_3, %c0_4] : memref<3x8x8xf32, #tpu.memory_space<vmem>>, vector<1x8x8xf32>
    %3 = vector.shape_cast %2 : vector<1x8x8xf32> to vector<8x8xf32>
    %cst = arith.constant dense<0.000000e+00> : vector<8x256xf32>
    %4 = tpu.matmul %3, %1, %cst {dimension_numbers = #tpu.dot_dimension_numbers<[1], [0], [0], [1], [0, 0, 1, 1], [], []>} : vector<8x8xf32>, vector<8x256xf32>, vector<8x256xf32> -> vector<8x256xf32>
    %c0_5 = arith.constant 0 : index
    %c0_6 = arith.constant 0 : index
    %c0_7 = arith.constant 0 : index
    %5 = vector.load %arg2[%c0_5, %c0_6, %c0_7] : memref<1x8x256xf32, #tpu.memory_space<vmem>>, vector<1x8x256xf32>
    %6 = vector.shape_cast %5 : vector<1x8x256xf32> to vector<8x256xf32>
    %c1 = arith.constant 1 : index
    %c0_8 = arith.constant 0 : index
    %c0_9 = arith.constant 0 : index
    %7 = vector.load %arg6[%c1, %c0_8, %c0_9] : memref<3x8x8xf32, #tpu.memory_space<vmem>>, vector<1x8x8xf32>
    %8 = vector.shape_cast %7 : vector<1x8x8xf32> to vector<8x8xf32>
    %cst_10 = arith.constant dense<0.000000e+00> : vector<8x256xf32>
    %9 = tpu.matmul %8, %6, %cst_10 {dimension_numbers = #tpu.dot_dimension_numbers<[1], [0], [0], [1], [0, 0, 1, 1], [], []>} : vector<8x8xf32>, vector<8x256xf32>, vector<8x256xf32> -> vector<8x256xf32>
    %c0_11 = arith.constant 0 : index
    %c0_12 = arith.constant 0 : index
    %10 = vector.load %arg4[%c0_11, %c0_12] : memref<256x256xf32, #tpu.memory_space<vmem>>, vector<256x256xf32>
    %cst_13 = arith.constant dense<0.000000e+00> : vector<8x256xf32>
    %11 = tpu.matmul %9, %10, %cst_13 {dimension_numbers = #tpu.dot_dimension_numbers<[1], [1], [0], [0], [0, 0, 1, 0], [], []>} : vector<8x256xf32>, vector<256x256xf32>, vector<8x256xf32> -> vector<8x256xf32>
    %12 = arith.addf %4, %11 : vector<8x256xf32>
    %c0_14 = arith.constant 0 : index
    %c0_15 = arith.constant 0 : index
    %c0_16 = arith.constant 0 : index
    %13 = vector.load %arg3[%c0_14, %c0_15, %c0_16] : memref<1x8x256xf32, #tpu.memory_space<vmem>>, vector<1x8x256xf32>
    %14 = vector.shape_cast %13 : vector<1x8x256xf32> to vector<8x256xf32>
    %c2 = arith.constant 2 : index
    %c0_17 = arith.constant 0 : index
    %c0_18 = arith.constant 0 : index
    %15 = vector.load %arg6[%c2, %c0_17, %c0_18] : memref<3x8x8xf32, #tpu.memory_space<vmem>>, vector<1x8x8xf32>
    %16 = vector.shape_cast %15 : vector<1x8x8xf32> to vector<8x8xf32>
    %cst_19 = arith.constant dense<0.000000e+00> : vector<8x256xf32>
    %17 = tpu.matmul %16, %14, %cst_19 {dimension_numbers = #tpu.dot_dimension_numbers<[1], [0], [0], [1], [0, 0, 1, 1], [], []>} : vector<8x8xf32>, vector<8x256xf32>, vector<8x256xf32> -> vector<8x256xf32>
    %c0_20 = arith.constant 0 : index
    %c0_21 = arith.constant 0 : index
    %18 = vector.load %arg5[%c0_20, %c0_21] : memref<256x256xf32, #tpu.memory_space<vmem>>, vector<256x256xf32>
    %cst_22 = arith.constant dense<0.000000e+00> : vector<8x256xf32>
    %19 = tpu.matmul %17, %18, %cst_22 {dimension_numbers = #tpu.dot_dimension_numbers<[1], [1], [0], [0], [0, 0, 1, 0], [], []>} : vector<8x256xf32>, vector<256x256xf32>, vector<8x256xf32> -> vector<8x256xf32>
    %20 = arith.addf %12, %19 : vector<8x256xf32>
    %c0_23 = arith.constant 0 : index
    %c0_24 = arith.constant 0 : index
    %21 = vector.load %arg7[%c0_23, %c0_24] : memref<8x1xf32, #tpu.memory_space<vmem>>, vector<8x1xf32>
    %22 = vector.broadcast %21 : vector<8x1xf32> to vector<8x256xf32>
    %23 = arith.addf %20, %22 : vector<8x256xf32>
    %cst_25 = arith.constant 0.000000e+00 : f32
    %24 = vector.broadcast %cst_25 : f32 to vector<8x256xf32>
    %25 = arith.maximumf %23, %24 : vector<8x256xf32>
    %c0_26 = arith.constant 0 : index
    %c0_27 = arith.constant 0 : index
    %c0_28 = arith.constant 0 : index
    %26 = vector.load %arg8[%c0_26, %c0_27, %c0_28] : memref<1x8x256xf32, #tpu.memory_space<vmem>>, vector<1x8x256xf32>
    %27 = vector.shape_cast %26 : vector<1x8x256xf32> to vector<8x256xf32>
    %28 = vector.shape_cast %25 : vector<8x256xf32> to vector<1x8x256xf32>
    tpu.vector_store %arg8[%c0_26, %c0_27, %c0_28], %28 {strides = array<i32>} : memref<1x8x256xf32, #tpu.memory_space<vmem>>, vector<1x8x256xf32>,
    return
  }
  func.func @transform_0(%arg0: i32) -> (i32, i32, i32) {
    %c0_i32 = arith.constant 0 : i32
    %c0_i32_0 = arith.constant 0 : i32
    %c0_i32_1 = arith.constant 0 : i32
    return %arg0, %c0_i32, %c0_i32_0 : i32, i32, i32
  }
  func.func @transform_1(%arg0: i32) -> (i32, i32, i32) {
    %c0_i32 = arith.constant 0 : i32
    %c0_i32_0 = arith.constant 0 : i32
    %c0_i32_1 = arith.constant 0 : i32
    return %arg0, %c0_i32, %c0_i32_0 : i32, i32, i32
  }
  func.func @transform_2(%arg0: i32) -> (i32, i32, i32) {
    %c0_i32 = arith.constant 0 : i32
    %c0_i32_0 = arith.constant 0 : i32
    %c0_i32_1 = arith.constant 0 : i32
    return %arg0, %c0_i32, %c0_i32_0 : i32, i32, i32
  }
  func.func @transform_3(%arg0: i32) -> (i32, i32) {
    %c0_i32 = arith.constant 0 : i32
    %c0_i32_0 = arith.constant 0 : i32
    %c0_i32_1 = arith.constant 0 : i32
    return %c0_i32, %c0_i32_0 : i32, i32
  }
  func.func @transform_4(%arg0: i32) -> (i32, i32) {
    %c0_i32 = arith.constant 0 : i32
    %c0_i32_0 = arith.constant 0 : i32
    %c0_i32_1 = arith.constant 0 : i32
    return %c0_i32, %c0_i32_0 : i32, i32
  }
  func.func @transform_5(%arg0: i32) -> (i32, i32, i32) {
    %c0_i32 = arith.constant 0 : i32
    %c0_i32_0 = arith.constant 0 : i32
    %c0_i32_1 = arith.constant 0 : i32
    %c0_i32_2 = arith.constant 0 : i32
    return %c0_i32, %c0_i32_0, %c0_i32_1 : i32, i32, i32
  }
  func.func @transform_6(%arg0: i32) -> (i32, i32) {
    %c0_i32 = arith.constant 0 : i32
    %c0_i32_0 = arith.constant 0 : i32
    %c0_i32_1 = arith.constant 0 : i32
    return %c0_i32, %c0_i32_0 : i32, i32
  }
  func.func @transform_7(%arg0: i32) -> (i32, i32, i32) {
    %c0_i32 = arith.constant 0 : i32
    %c0_i32_0 = arith.constant 0 : i32
    %c0_i32_1 = arith.constant 0 : i32
    return %arg0, %c0_i32, %c0_i32_0 : i32, i32, i32
  }
}

</mosaic_0001>

<bundles_post_ra>
// kernel: tpu_custom_call.1
= control target key start
LH: loop header
LB: loop body
LE: loop exit
PB: predicated region body
PF: predicated region fallthrough
CT: control target
= control target key end

     0   :  { %s1913_s0 = inlined_call_operand.hbm [shape: f32[2,8,256], index: 0, kind: input, shape index: {}]   ;;  %s1914_s1 = inlined_call_operand.hbm [shape: f32[2,8,256], index: 1, kind: input, shape index: {}]   ;;  %s1915_s2 = inlined_call_operand.hbm [shape: f32[2,8,256], index: 2, kind: input, shape index: {}]   ;;  %s1916_s3 = inlined_call_operand.hbm [shape: f32[256,256], index: 3, kind: input, shape index: {}]   ;;  %s1917_s4 = inlined_call_operand.hbm [shape: f32[256,256], index: 4, kind: input, shape index: {}]   ;;  %s1918_s5 = inlined_call_operand.vmem [shape: f32[3,8,8], index: 5, kind: input, shape index: {}]   ;;  %s1919_s6 = inlined_call_operand.vmem [shape: f32[8,1], index: 6, kind: input, shape index: {}]   ;;  %s1920_s7 = inlined_call_operand.hbm [shape: f32[2,8,256], index: 7, kind: output, shape index: {}]  }
   0x1   :  { %1938 = sst [smem:[#allocation19_spill]] %s1914_s1 }
   0x2   :  { %1939 = sst [smem:[#allocation20_spill]] %s1916_s3 }
   0x3   :  { %12 = vsyncpa [#allocation3], 0 }
   0x4   :  { %14 = vsyncpa [#allocation3 + $0x1], 0 }
   0x5   :  { %15 = vsyncpa [#allocation6], 0 }
   0x6   :  { %17 = vsyncpa [#allocation6 + $0x1], 0 }
   0x7   :  { %18 = vsyncpa [#allocation9], 0 }
   0x8   :  { %19 = vsyncpa [#allocation4], 0 }
   0x9   :  { %21 = vsyncpa [#allocation4 + $0x1], 0  ;;  %s1583_s24 = smov 0   ;;  %s1585_s25 = smov 0  }
   0xa   :  { %s1587_s26 = smov 0   ;;  %s1589_s27 = smov 0  }
   0xb LB: > { %1940 = sst [smem:[#allocation16_spill]] %s1531_s27  ;;  %s1604_s28 = sadd.s32 4294967295, %s1531_s27   ;;  %s1531_s27 = sphi %s1589_s27, %s1970_s27   ;;  %s1527_s26 = sphi %s1587_s26, %s1974_s26   ;;  %s1523_s25 = sphi %s1585_s25, %s1973_s25   ;;  %s1519_s24 = sphi %s1583_s24, %s1972_s24  }
   0xc   : > { %s1062_s29 = sadd.s32 4294967294, %s1531_s27   ;;  %p47_p0 = scmp.ne.s32.totalorder %s1523_s25, %s1519_s24 }
   0xd   : > { %p1921_p1 = scmp.eq.s32.totalorder %s1604_s28, 0  ;;  %p213_p3 = scmp.eq.s32.totalorder %s1062_s29, 1 }
   0xe   : > { %p1063_p5 = scmp.ge.s32.totalorder %s1531_s27, 1  ;;  %p220_p7 = scmp.lt.s32.totalorder %s1531_s27, 3 }
   0xf   : > { %p1613_p4 = por %p1921_p1, %p47_p0  ;;  %p1618_p6 = por %p213_p3, %p47_p0 }
  0x10   : > { %p1623_p8 = pnand %p1063_p5, %p220_p7  ;;  %s1533_s10 = smov [#allocation8]  }
  0x11   : > { %s1941_s30 = scalar_select %p1613_p4, 1, 0 }
  0x12   : > { %s1942_s8 = scalar_select %p1618_p6, 1, 0 }
  0x13   : > { %s1943_s9 = scalar_select %p1623_p8, 1, 0 }
  0x14   : > { %s232_s11 = sshll.u32 %s1533_s10, 4  ;;  %p1245_p9 = pneg %p1623_p8  ;;  %s1627_s11 = int_to_ptr.vmem [resolvable:$true] %s232_s11 }
  0x15   : > { %s1639_s13 = sadd.s32 1, %s1531_s27   ;;  %s34_s14 = sadd.s32 1, %s1527_s26 }
  0x16   : > { %p1634_p11 = pnand %p1245_p9, %p1921_p1  ;;  %1945 = sst [smem:[#allocation17_spill]] %s1639_s13 }
  0x17   : > { %s31_s15 = ssub.s32 %s1531_s27, %s1639_s13  ;;  %s1946_s3 = sld [smem:[#allocation20_spill]] }
  0x18   : > { %s1944_s12 = scalar_select %p1634_p11, 1, 0 }
  0x19   : > { %p1927_p13 = pneg %p1634_p11 }
  0x1d   : > { %s1311_s18 = scalar_lea.hbm %s1946_s3, 8192 }
  0x1e   : > { %p1312_p12 = scmp.ne.s32.totalorder %s1946_s3, %s1311_s18  ;;  %p1318_p5 = scmp.lt.u32.totalorder %s1311_s18, %s1946_s3 }
  0x20   : > { %p1314_p0 = pnand %p1927_p13, %p1312_p12 }
  0x22   : > { %p1315_p3 = pneg %p1314_p0 }
  0x24   : > { %p1320_p7 = pnand %p1318_p5, %p1315_p3 }
  0x26   : > { %1323 = shalt.err (!%p1320_p7)
}
  0x27   : > { %s1324_s23 = scalar_lea.vmem %s1627_s11, 8192  ;;  %p1332_p2 = scmp.lt.s32.totalorder %s1627_s11, %s1627_s11 }
  0x28   : > { %p1325_p9 = scmp.ne.s32.totalorder %s1627_s11, %s1324_s23  ;;  %p1333_p12 = scmp.lt.s32.totalorder %s1324_s23, %s1324_s23 }
  0x2a   : > { %p1327_p10 = pnand %p1325_p9, %p1927_p13  ;;  %p1334_p0 = por %p1333_p12, %p1332_p2 }
  0x2c   : > { %p1328_p1 = pneg %p1327_p10 }
  0x2e   : > { %p1335_p6 = pnand %p1334_p0, %p1328_p1 }
  0x30   : > { %1338 = shalt.err (!%p1335_p6)
}
  0x31   : > { %s1922_s29 = smov 256   ;;  %s1924_s10 = smov 16  }
  0x32   : > { %1248 = dma.hbm_to_vmem [thread:$0]  (!%p1634_p11), %s1946_s3, 8192, %s1627_s11, [#allocation9], %s1922_s29, %s1922_s29, %s1924_s10  }
  0x33   : > { %p32_p1 = scmp.eq.s32.totalorder %s31_s15, 0  ;;  %p41_p2 = scmp.ne.s32.totalorder %s1527_s26, %s1523_s25 }
  0x34   : > { %p42_p6 = scmp.eq.s32.totalorder %s1531_s27, 0  ;;  %p1268_p10 = scmp.lt.s32.totalorder %s1531_s27, 2 }
  0x35   : > { %s1679_s18 = scalar_select %p32_p1, %s1527_s26, %s34_s14  }
  0x36   : > { %p43_p3 = por %p42_p6, %p41_p2  ;;  %p1948_p5 = scmp.eq.s32.totalorder %s1604_s28, 1 }
  0x37   : > { %1947 = sst [smem:[#allocation18_spill]] %s1679_s18  ;;  %s1923_s20 = sand.u32 1, %s1527_s26  }
  0x38   : > { %p1683_p7 = por %p1948_p5, %p41_p2  ;;  %s1689_s21 = sshll.u32 %s1531_s27, 8 }
  0x39   : > { %s1693_s22 = sshll.u32 %s1923_s20, 4  ;;  %p1695_p9 = pnand %p1268_p10, %p43_p3 }
  0x3a   : > { %s1949_s19 = scalar_select %p1683_p7, 1, 0 }
  0x3b   : > { %s1950_s11 = scalar_select %p1695_p9, 1, 0 }
  0x3c   : > { %s284_s14 = sand.u32 1, %s1531_s27   ;;  %s1951_s1 = sld [smem:[#allocation19_spill]] }
  0x3d   : > { %s288_s17 = scalar_lea.vmem [#allocation5], %s1693_s22  ;;  %s1709_s20 = scalar_lea.sflag [#allocation6], %s284_s14 }
  0x3e   : > { %s296_s29 = sshll.u32 %s288_s17, 4  ;;  %p1715_p0 = pneg %p1695_p9  ;;  %s1707_s29 = int_to_ptr.vmem [resolvable:$true] %s296_s29 }
  0x40   : > { %s1952_s3 = scalar_select %p1715_p0, 1, 0 }
  0x42   : > { %s1704_s16 = scalar_lea.hbm %s1951_s1, %s1689_s21  ;;  %s1344_s18 = scalar_lea.hbm %s1951_s1, 512 }
  0x43   : > { %s1339_s10 = scalar_lea.hbm %s1704_s16, 256  ;;  %p1345_p6 = scmp.lt.u32.totalorder %s1704_s16, %s1951_s1 }
  0x44   : > { %p1340_p12 = scmp.ne.s32.totalorder %s1704_s16, %s1339_s10  ;;  %p1346_p10 = scmp.lt.u32.totalorder %s1344_s18, %s1339_s10 }
  0x45   : > { %p1348_p5 = scmp.lt.u32.totalorder %s1339_s10, %s1704_s16 }
  0x46   : > { %p1342_p1 = pnand %p1715_p0, %p1340_p12  ;;  %p1347_p3 = por %p1346_p10, %p1345_p6 }
  0x48   : > { %p1343_p2 = pneg %p1342_p1  ;;  %p1349_p13 = por %p1348_p5, %p1347_p3 }
  0x4a   : > { %p1350_p7 = pnand %p1349_p13, %p1343_p2 }
  0x4c   : > { %1353 = shalt.err (!%p1350_p7)
}
  0x4d   : > { %s1354_s14 = scalar_lea.vmem %s1707_s29, 256  ;;  %s1536_s15 = smov [#allocation5]  }
  0x4e   : > { %p1355_p12 = scmp.ne.s32.totalorder %s1707_s29, %s1354_s14  ;;  %s1359_s23 = sshll.u32 %s1536_s15, 4  ;;  %s1360_s23 = int_to_ptr.vmem [resolvable:$false] %s1359_s23 }
  0x4f   : > { %s1361_s13 = scalar_lea.vmem %s1360_s23, 512  ;;  %p1362_p8 = scmp.lt.s32.totalorder %s1707_s29, %s1360_s23 }
  0x50   : > { %p1357_p1 = pnand %p1355_p12, %p1715_p0  ;;  %p1363_p11 = scmp.lt.s32.totalorder %s1361_s13, %s1354_s14 }
  0x52   : > { %p1358_p4 = pneg %p1357_p1  ;;  %p1364_p6 = por %p1363_p11, %p1362_p8 }
  0x54   : > { %p1365_p10 = pnand %p1364_p6, %p1358_p4 }
  0x56   : > { %1368 = shalt.err (!%p1365_p10)
}
  0x57   : > { %1258 = dma.hbm_to_vmem [thread:$0]  (!%p1695_p9), %s1704_s16, 256, %s1707_s29, %s1709_s20  }
  0x58   : > { %s1537_s10 = smov [#allocation10]   ;;  %s1369_s15 = scalar_lea.hbm %s1917_s4, 8192 }
  0x59   : > { %s245_s18 = sshll.u32 %s1537_s10, 4  ;;  %p1370_p8 = scmp.ne.s32.totalorder %s1917_s4, %s1369_s15  ;;  %s246_s18 = int_to_ptr.vmem [resolvable:$true] %s245_s18 }
  0x5a   : > { %p1953_p4 = scmp.ne.s32.totalorder %s1944_s12, 0  ;;  %p1376_p2 = scmp.lt.u32.totalorder %s1369_s15, %s1917_s4 }
  0x5c   : > { %p1954_p11 = pneg %p1953_p4 }
  0x5e   : > { %p1372_p13 = pnand %p1370_p8, %p1954_p11 }
  0x60   : > { %p1373_p7 = pneg %p1372_p13 }
  0x62   : > { %p1378_p3 = pnand %p1376_p2, %p1373_p7 }
  0x64   : > { %1381 = shalt.err (!%p1378_p3)
}
  0x65   : > { %s1382_s29 = scalar_lea.vmem %s246_s18, 8192  ;;  %p1955_p12 = pmov %p1954_p11 }
  0x66   : > { %p1383_p5 = scmp.ne.s32.totalorder %s246_s18, %s1382_s29  ;;  %p1390_p10 = scmp.lt.s32.totalorder %s246_s18, %s246_s18 }
  0x67   : > { %p1391_p9 = scmp.lt.s32.totalorder %s1382_s29, %s1382_s29 }
  0x68   : > { %p1385_p1 = pnand %p1383_p5, %p1955_p12 }
  0x69   : > { %p1392_p0 = por %p1391_p9, %p1390_p10 }
  0x6a   : > { %p1386_p6 = pneg %p1385_p1 }
  0x6c   : > { %p1393_p8 = pnand %p1392_p0, %p1386_p6 }
  0x6e   : > { %1396 = shalt.err (!%p1393_p8)
}
  0x6f   : > { %s1956_s1 = smov 16   ;;  %s1957_s27 = smov 256  }
  0x70   : > { %1251 = dma.hbm_to_vmem [thread:$0]  (!%p1953_p4), %s1917_s4, 8192, %s246_s18, [#allocation9], %s1957_s27, %s1957_s27, %s1956_s1  }
  0x71   : > { %s1766_s23 = scalar_lea.hbm %s1913_s0, %s1689_s21  ;;  %s269_s12 = scalar_lea.vmem [#allocation2], %s1693_s22 }
  0x72   : > { %s277_s14 = sshll.u32 %s269_s12, 4  ;;  %s1958_s13 = sand.u32 1, %s1527_s26   ;;  %s278_s14 = int_to_ptr.vmem [resolvable:$true] %s277_s14 }
  0x73   : > { %s266_s29 = scalar_lea.sflag [#allocation3], %s1958_s13  ;;  %s1397_s16 = scalar_lea.hbm %s1766_s23, 256 }
  0x74   : > { %p1398_p9 = scmp.ne.s32.totalorder %s1766_s23, %s1397_s16  ;;  %p1959_p0 = scmp.ne.s32.totalorder %s1952_s3, 0 }
  0x75   : > { %s1402_s27 = scalar_lea.hbm %s1913_s0, 512  ;;  %p1403_p4 = scmp.lt.u32.totalorder %s1766_s23, %s1913_s0 }
  0x76   : > { %p1400_p11 = pnand %p1398_p9, %p1959_p0  ;;  %p1404_p7 = scmp.lt.u32.totalorder %s1402_s27, %s1397_s16 }
  0x77   : > { %p1406_p3 = scmp.lt.u32.totalorder %s1397_s16, %s1766_s23 }
  0x78   : > { %p1401_p13 = pneg %p1400_p11  ;;  %p1405_p2 = por %p1404_p7, %p1403_p4 }
  0x7a   : > { %p1407_p5 = por %p1406_p3, %p1405_p2 }
  0x7c   : > { %p1408_p12 = pnand %p1407_p5, %p1401_p13 }
  0x7e   : > { %1411 = shalt.err (!%p1408_p12)
}
  0x7f   : > { %s1412_s15 = scalar_lea.vmem %s278_s14, 256  ;;  %s1538_s12 = smov [#allocation2]  }
  0x80   : > { %p1413_p1 = scmp.ne.s32.totalorder %s278_s14, %s1412_s15  ;;  %s1417_s13 = sshll.u32 %s1538_s12, 4  ;;  %s1418_s13 = int_to_ptr.vmem [resolvable:$false] %s1417_s13 }
  0x81   : > { %s1419_s18 = scalar_lea.vmem %s1418_s13, 512  ;;  %p1420_p8 = scmp.lt.s32.totalorder %s278_s14, %s1418_s13 }
  0x82   : > { %p1415_p6 = pnand %p1413_p1, %p1959_p0  ;;  %p1421_p9 = scmp.lt.s32.totalorder %s1419_s18, %s1412_s15 }
  0x84   : > { %p1416_p10 = pneg %p1415_p6  ;;  %p1422_p11 = por %p1421_p9, %p1420_p8 }
  0x86   : > { %p1423_p4 = pnand %p1422_p11, %p1416_p10 }
  0x88   : > { %1426 = shalt.err (!%p1423_p4)
}
  0x89   : > { %p1960_p7 = scmp.ne.s32.totalorder %s1950_s11, 0  ;;  %s1792_s27 = scalar_lea.hbm %s1915_s2, %s1689_s21 }
  0x8a   : > { %s307_s10 = scalar_lea.vmem [#allocation7], %s1693_s22  ;;  %s1427_s15 = scalar_lea.hbm %s1792_s27, 256 }
  0x8b   : > { %1255 = dma.hbm_to_vmem [thread:$0]  (!%p1960_p7), %s1766_s23, 256, %s278_s14, %s266_s29  }
  0x8c   : > { %s315_s17 = sshll.u32 %s307_s10, 4  ;;  %p1428_p13 = scmp.ne.s32.totalorder %s1792_s27, %s1427_s15  ;;  %s316_s17 = int_to_ptr.vmem [resolvable:$true] %s315_s17 }
  0x8d   : > { %s1432_s23 = scalar_lea.hbm %s1915_s2, 512  ;;  %p1433_p5 = scmp.lt.u32.totalorder %s1792_s27, %s1915_s2 }
  0x8e   : > { %p1430_p2 = pnand %p1428_p13, %p1959_p0  ;;  %p1434_p12 = scmp.lt.u32.totalorder %s1432_s23, %s1427_s15 }
  0x8f   : > { %p1436_p6 = scmp.lt.u32.totalorder %s1427_s15, %s1792_s27 }
  0x90   : > { %p1431_p3 = pneg %p1430_p2  ;;  %p1435_p1 = por %p1434_p12, %p1433_p5 }
  0x92   : > { %p1437_p10 = por %p1436_p6, %p1435_p1 }
  0x94   : > { %p1438_p8 = pnand %p1437_p10, %p1431_p3 }
  0x96   : > { %1441 = shalt.err (!%p1438_p8)
}
  0x97   : > { %s1442_s21 = scalar_lea.vmem %s316_s17, 256  ;;  %s1539_s22 = smov [#allocation7]  }
  0x98   : > { %p1443_p9 = scmp.ne.s32.totalorder %s316_s17, %s1442_s21  ;;  %s1447_s18 = sshll.u32 %s1539_s22, 4  ;;  %s1448_s18 = int_to_ptr.vmem [resolvable:$false] %s1447_s18 }
  0x99   : > { %s1449_s16 = scalar_lea.vmem %s1448_s18, 512  ;;  %p1450_p13 = scmp.lt.s32.totalorder %s316_s17, %s1448_s18 }
  0x9a   : > { %p1445_p11 = pnand %p1443_p9, %p1959_p0  ;;  %p1451_p2 = scmp.lt.s32.totalorder %s1449_s16, %s1442_s21 }
  0x9c   : > { %p1446_p4 = pneg %p1445_p11  ;;  %p1452_p7 = por %p1451_p2, %p1450_p13 }
  0x9e   : > { %p1453_p5 = pnand %p1452_p7, %p1446_p4 }
  0xa0   : > { %1456 = shalt.err (!%p1453_p5)
}
  0xa1   : > { %p1961_p12 = scmp.ne.s32.totalorder %s1950_s11, 0  ;;  %p1962_p3 = scmp.ne.s32.totalorder %s1943_s9, 0 }
  0xa2   : > { %s1816_s3 = sand.u32 (!%p1962_p3), 1, %s1523_s25   ;;  %p1963_p0 = scmp.ne.s32.totalorder (!%p1962_p3), %s1941_s30, 0 }
  0xa3   : > { %1261 = dma.hbm_to_vmem [thread:$0]  (!%p1961_p12), %s1792_s27, 256, %s316_s17, %s1709_s20  }
  0xa4   : > { %324 = sbr.rel (%p1962_p3) target bundleno = 847 (0x34f), region = 48  ;;  %s1819_s1 = sshll.u32 (!%p1962_p3), %s1816_s3, 4 }
  0xa5   : > { %s327_s10 = scalar_lea.sflag (!%p1962_p3), [#allocation3], %s1816_s3  ;;  %s330_s15 = scalar_lea.vmem (!%p1962_p3), [#allocation2], %s1819_s1 }
  0xab   : > { %1502 = dma.done.wait (%p1963_p0), %s327_s10, 256  }
  0xac   : > { %1504 = vsyncadd (%p1963_p0), %s327_s10, 4294967040  ;;  %s335_s9 = sand.u32 1, %s1604_s28   ;;  %s339_s11 = scalar_lea.vmem [#allocation5], %s1819_s1 }
  0xad   : > { %s336_s20 = scalar_lea.sflag [#allocation6], %s335_s9 }
  0xae   : > { %1506 = dma.done.wait (%p1963_p0), %s336_s20, 512  }
  0xaf   : > { %1508 = vsyncadd (%p1963_p0), %s336_s20, 4294966784  ;;  %s348_s27 = scalar_lea.vmem [#allocation7], %s1819_s1  ;;  %p1964_p7 = scmp.eq.s32.totalorder %s1604_s28, 0 }
  0xb1   : > { %1510 = dma.done.wait (%p1964_p7), [#allocation9], 16384   ;;  %p1965_p1 = pmov %p1964_p7 }
  0xb2   : > { %v1540_v0 = vmov 0.0   ;;  %v401_v1 = vld [vmem:[%s339_s11 + $0x8] sm:$0xff]  ;;  %v400_v2 = vld [vmem:[%s339_s11] sm:$0xff]  ;;  %vm404_vm0 = vcmask 64512   ;;  %s1096_s22 = sshll.u32 %s1604_s28, 8  ;;  %s396_s18 = scalar_lea.vmem [#allocation11], %s1819_s1 }
  0xb3   : > { %1512 = vsyncadd (%p1965_p1), [#allocation9], 4294950912  ;;  %472 = vmatprep.mubr.f32.mxu0 %v1540_v0  ;;  %681 = vmatprep.mubr.f32.mxu1 %v1540_v0  ;;  %v1083_v3 = vld [vmem:[%s1918_s5 + $0x8] sm:$0xff]  ;;  %v482_v5 = vld [vmem:[#allocation8 + $0x18] sm:$0xff]  ;;  %s930_s16 = sshll.u32 %s396_s18, 4  ;;  %s1869_s9 = scalar_lea.hbm %s1920_s7, %s1096_s22  ;;  %s1871_s16 = int_to_ptr.vmem [resolvable:$true] %s930_s16 }
  0xb4   : > { %408 = vmatprep.subr.mxu0 %v401_v1  ;;  %v480_v4 = vld [vmem:[#allocation8 + $0x8] sm:$0xff]  ;;  %v479_v7 = vld [vmem:[#allocation8] sm:$0xff]  ;;  %v481_v8 = vld [vmem:[#allocation8 + $0x10] sm:$0xff]  ;;  %s916_s20 = scalar_lea.sflag [#allocation4], %s1816_s3  ;;  %s1457_s11 = scalar_lea.vmem %s1871_s16, 256 }
  0xb5   : > { %409 = vmatpush1.msra.mxu0 %v400_v2  ;;  %v1097_v6 = vpack.c.bf16 %v482_v5, %v480_v4  ;;  %v484_v9 = vld [vmem:[#allocation8 + $0x28] sm:$0xff]  ;;  %v486_v10 = vld [vmem:[#allocation8 + $0x38] sm:$0xff]  ;;  %v1099_v11 = vpack.c.bf16 %v481_v8, %v479_v7  ;;  %v483_v13 = vld [vmem:[#allocation8 + $0x20] sm:$0xff]  ;;  %p1458_p6 = scmp.ne.s32.totalorder %s1871_s16, %s1457_s11  ;;  %p1966_p10 = scmp.ne.s32.totalorder %s1949_s19, 0 }
  0xb6   : > { %1084 = vmatmul.mubr.msk.f32.vlgmr.msra.gmra.mrb[0].mxu0 %vm404_vm0, %v1083_v3  ;;  %v1101_v12 = vpack.c.bf16 %v486_v10, %v484_v9  ;;  %v485_v14 = vld [vmem:[#allocation8 + $0x30] sm:$0xff]  ;;  %v488_v15 = vld [vmem:[#allocation8 + $0x48] sm:$0xff]  ;;  %v490_v16 = vld [vmem:[#allocation8 + $0x58] sm:$0xff]  ;;  %s1542_s28 = smov [#allocation11]  }
  0xb7   : > { %1098 = vmatprep.subr.bf16.mxu0 %v1097_v6  ;;  %v1103_v17 = vpack.c.bf16 %v485_v14, %v483_v13  ;;  %v1105_v18 = vpack.c.bf16 %v490_v16, %v488_v15  ;;  %v487_v19 = vld [vmem:[#allocation8 + $0x40] sm:$0xff]  ;;  %v489_v20 = vld [vmem:[#allocation8 + $0x50] sm:$0xff]  ;;  %v492_v21 = vld [vmem:[#allocation8 + $0x68] sm:$0xff]  ;;  %p1459_p8 = pnand %p1458_p6, %p1966_p10  ;;  %s1461_s1 = sshll.u32 %s1542_s28, 4  ;;  %s1462_s1 = int_to_ptr.vmem [resolvable:$false] %s1461_s1 }
  0xb8   : > { %v494_v22 = vld [vmem:[#allocation8 + $0x78] sm:$0xff]  ;;  %v1107_v23 = vpack.c.bf16 %v489_v20, %v487_v19  ;;  %v491_v25 = vld [vmem:[#allocation8 + $0x60] sm:$0xff]  ;;  %v493_v26 = vld [vmem:[#allocation8 + $0x70] sm:$0xff]  ;;  %p1464_p11 = scmp.lt.s32.totalorder %s1871_s16, %s1462_s1 }
  0xb9   : > { %v1109_v24 = vpack.c.bf16 %v494_v22, %v492_v21  ;;  %v496_v27 = vld [vmem:[#allocation8 + $0x88] sm:$0xff]  ;;  %v498_v28 = vld [vmem:[#allocation8 + $0x98] sm:$0xff]  ;;  %v1111_v29 = vpack.c.bf16 %v493_v26, %v491_v25  ;;  %v495_v31 = vld [vmem:[#allocation8 + $0x80] sm:$0xff]  ;;  %p1460_p9 = pneg %p1459_p8 }
  0xba   : > { %v1113_v30 = vpack.c.bf16 %v498_v28, %v496_v27  ;;  %v497_v32 = vld [vmem:[#allocation8 + $0x90] sm:$0xff]  ;;  %v500_v33 = vld [vmem:[#allocation8 + $0xa8] sm:$0xff]  ;;  %v502_v34 = vld [vmem:[#allocation8 + $0xb8] sm:$0xff] }
  0xbb   : > { %v1115_v35 = vpack.c.bf16 %v497_v32, %v495_v31  ;;  %v1117_v36 = vpack.c.bf16 %v502_v34, %v500_v33  ;;  %v499_v37 = vld [vmem:[#allocation8 + $0xa0] sm:$0xff]  ;;  %v501_v38 = vld [vmem:[#allocation8 + $0xb0] sm:$0xff]  ;;  %v504_v39 = vld [vmem:[#allocation8 + $0xc8] sm:$0xff] }
  0xbc   : > { %1100 = vmatpush1.bf16.xpose.msra.mxu0 %v1099_v11  ;;  %v506_v40 = vld [vmem:[#allocation8 + $0xd8] sm:$0xff]  ;;  %v1119_v41 = vpack.c.bf16 %v501_v38, %v499_v37  ;;  %v503_v43 = vld [vmem:[#allocation8 + $0xc0] sm:$0xff]  ;;  %v505_v44 = vld [vmem:[#allocation8 + $0xd0] sm:$0xff] }
  0xbd   : > { %1102 = vmatprep.subr.bf16.mxu0 %v1101_v12  ;;  %v1121_v42 = vpack.c.bf16 %v506_v40, %v504_v39  ;;  %v508_v45 = vld [vmem:[#allocation8 + $0xe8] sm:$0xff]  ;;  %v510_v46 = vld [vmem:[#allocation8 + $0xf8] sm:$0xff]  ;;  %v1123_v47 = vpack.c.bf16 %v505_v44, %v503_v43  ;;  %v507_v49 = vld [vmem:[#allocation8 + $0xe0] sm:$0xff] }
  0xbe   : > { %v1125_v48 = vpack.c.bf16 %v510_v46, %v508_v45  ;;  %v509_v50 = vld [vmem:[#allocation8 + $0xf0] sm:$0xff]  ;;  %v512_v51 = vld [vmem:[#allocation8 + $0x108] sm:$0xff]  ;;  %v514_v52 = vld [vmem:[#allocation8 + $0x118] sm:$0xff] }
  0xbf   : > { %v1127_v53 = vpack.c.bf16 %v509_v50, %v507_v49  ;;  %v1129_v54 = vpack.c.bf16 %v514_v52, %v512_v51  ;;  %v511_v55 = vld [vmem:[#allocation8 + $0x100] sm:$0xff]  ;;  %v513_v56 = vld [vmem:[#allocation8 + $0x110] sm:$0xff]  ;;  %v516_v57 = vld [vmem:[#allocation8 + $0x128] sm:$0xff] }
  0xc0   : > { %v518_v58 = vld [vmem:[#allocation8 + $0x138] sm:$0xff]  ;;  %v1131_v59 = vpack.c.bf16 %v513_v56, %v511_v55  ;;  %v515_v61 = vld [vmem:[#allocation8 + $0x120] sm:$0xff]  ;;  %v517_v62 = vld [vmem:[#allocation8 + $0x130] sm:$0xff] }
  0xc1   : > { %v1133_v60 = vpack.c.bf16 %v518_v58, %v516_v57  ;;  %v520_v63 = vld [vmem:[#allocation8 + $0x148] sm:$0xff]  ;;  %v522_v1 = vld [vmem:[#allocation8 + $0x158] sm:$0xff]  ;;  %v1135_v2 = vpack.c.bf16 %v517_v62, %v515_v61  ;;  %v519_v4 = vld [vmem:[#allocation8 + $0x140] sm:$0xff] }
  0xc2   : > { %v1137_v3 = vpack.c.bf16 %v522_v1, %v520_v63  ;;  %v521_v5 = vld [vmem:[#allocation8 + $0x150] sm:$0xff]  ;;  %v524_v6 = vld [vmem:[#allocation8 + $0x168] sm:$0xff]  ;;  %v526_v7 = vld [vmem:[#allocation8 + $0x178] sm:$0xff] }
  0xc3   : > { %v1139_v8 = vpack.c.bf16 %v521_v5, %v519_v4  ;;  %v1141_v9 = vpack.c.bf16 %v526_v7, %v524_v6  ;;  %v523_v10 = vld [vmem:[#allocation8 + $0x160] sm:$0xff]  ;;  %v525_v11 = vld [vmem:[#allocation8 + $0x170] sm:$0xff]  ;;  %v528_v12 = vld [vmem:[#allocation8 + $0x188] sm:$0xff] }
  0xc4   : > { %1104 = vmatpush1.bf16.xpose.msra.mxu0 %v1103_v17  ;;  %v530_v13 = vld [vmem:[#allocation8 + $0x198] sm:$0xff]  ;;  %v1143_v14 = vpack.c.bf16 %v525_v11, %v523_v10  ;;  %v397_v16 = vld [vmem:[%s330_s15] sm:$0xff]  ;;  %v767_v17 = vld [vmem:[#allocation10 + $0x8] sm:$0xff] }
  0xc5   : > { %1106 = vmatprep.subr.bf16.mxu0 %v1105_v18  ;;  %v398_v15 = vld [vmem:[%s330_s15 + $0x8] sm:$0xff]  ;;  %v1145_v18 = vpack.c.bf16 %v530_v13, %v528_v12  ;;  %v399_v20 = vld [vmem:[%s1918_s5] sm:$0xff]  ;;  %v529_v27 = vld [vmem:[#allocation8 + $0x190] sm:$0xff] }
  0xc6   : > { %617 = vmatprep.subr.mxu1 %v398_v15  ;;  %v769_v19 = vld [vmem:[#allocation10 + $0x18] sm:$0xff]  ;;  %v766_v22 = vld [vmem:[#allocation10] sm:$0xff]  ;;  %v533_v39 = vld [vmem:[#allocation8 + $0x1b0] sm:$0xff] }
  0xc7   : > { %618 = vmatpush1.msra.mxu1 %v397_v16  ;;  %v1161_v21 = vpack.c.bf16 %v769_v19, %v767_v17  ;;  %v773_v25 = vld [vmem:[#allocation10 + $0x38] sm:$0xff]  ;;  %v527_v26 = vld [vmem:[#allocation8 + $0x180] sm:$0xff]  ;;  %v537_v51 = vld [vmem:[#allocation8 + $0x1d0] sm:$0xff] }
  0xc8   : > { %1085 = vmatmul.mubr.msk.f32.vlgmr.msra.gmra.mrb[0].mxu1 %vm404_vm0, %v399_v20  ;;  %v1147_v32 = vpack.c.bf16 %v529_v27, %v527_v26  ;;  %v770_v34 = vld [vmem:[#allocation10 + $0x20] sm:$0xff]  ;;  %v777_v37 = vld [vmem:[#allocation10 + $0x58] sm:$0xff]  ;;  %v541_v63 = vld [vmem:[#allocation8 + $0x1f0] sm:$0xff] }
  0xc9   : > { %1162 = vmatprep.subr.bf16.mxu1 %v1161_v21  ;;  %v531_v38 = vld [vmem:[#allocation8 + $0x1a0] sm:$0xff]  ;;  %v781_v49 = vld [vmem:[#allocation10 + $0x78] sm:$0xff]  ;;  %v784_v6 = vld [vmem:[#allocation10 + $0x90] sm:$0xff] }
  0xca   : > { %v1151_v44 = vpack.c.bf16 %v533_v39, %v531_v38  ;;  %v774_v46 = vld [vmem:[#allocation10 + $0x40] sm:$0xff]  ;;  %v785_v61 = vld [vmem:[#allocation10 + $0x98] sm:$0xff]  ;;  %v787_v7 = vld [vmem:[#allocation10 + $0xa8] sm:$0xff] }
  0xcb   : > { %v535_v50 = vld [vmem:[#allocation8 + $0x1c0] sm:$0xff]  ;;  %v689_v4 = vld [vmem:[%s348_s27 + $0x8] sm:$0xff]  ;;  %v788_v12 = vld [vmem:[#allocation10 + $0xb0] sm:$0xff] }
  0xcc   : > { %1108 = vmatpush1.bf16.xpose.msra.mxu0 %v1107_v23  ;;  %v768_v23 = vld [vmem:[#allocation10 + $0x10] sm:$0xff]  ;;  %v1155_v56 = vpack.c.bf16 %v537_v51, %v535_v50  ;;  %v778_v58 = vld [vmem:[#allocation10 + $0x60] sm:$0xff]  ;;  %v791_v13 = vld [vmem:[#allocation10 + $0xc8] sm:$0xff] }
  0xcd   : > { %1110 = vmatprep.subr.bf16.mxu0 %v1109_v24  ;;  %v771_v24 = vld [vmem:[#allocation10 + $0x28] sm:$0xff]  ;;  %v1163_v28 = vpack.c.bf16 %v768_v23, %v766_v22  ;;  %v539_v62 = vld [vmem:[#allocation8 + $0x1e0] sm:$0xff]  ;;  %v797_v20 = vld [vmem:[#allocation10 + $0xf8] sm:$0xff] }
  0xce   : > { %v1165_v31 = vpack.c.bf16 %v773_v25, %v771_v24  ;;  %v782_v5 = vld [vmem:[#allocation10 + $0x80] sm:$0xff]  ;;  %v795_v19 = vld [vmem:[#allocation10 + $0xe8] sm:$0xff]  ;;  %v796_v24 = vld [vmem:[#allocation10 + $0xf0] sm:$0xff] }
  0xcf   : > { %1164 = vmatpush1.bf16.xpose.msra.mxu1 %v1163_v28  ;;  %v786_v11 = vld [vmem:[#allocation10 + $0xa0] sm:$0xff]  ;;  %v1189_v22 = vpack.c.bf16 %v797_v20, %v795_v19  ;;  %v799_v25 = vld [vmem:[#allocation10 + $0x108] sm:$0xff]  ;;  %v801_v26 = vld [vmem:[#allocation10 + $0x118] sm:$0xff] }
  0xd0   : > { %1166 = vmatprep.subr.bf16.mxu1 %v1165_v31  ;;  %v1183_v15 = vpack.c.bf16 %v788_v12, %v786_v11  ;;  %v790_v17 = vld [vmem:[#allocation10 + $0xc0] sm:$0xff]  ;;  %v1193_v28 = vpack.c.bf16 %v801_v26, %v799_v25  ;;  %v803_v31 = vld [vmem:[#allocation10 + $0x128] sm:$0xff]  ;;  %v809_v38 = vld [vmem:[#allocation10 + $0x158] sm:$0xff] }
  0xd1   : > { %v794_v23 = vld [vmem:[#allocation10 + $0xe0] sm:$0xff]  ;;  %v817_v50 = vld [vmem:[#allocation10 + $0x198] sm:$0xff]  ;;  %v1086_v11 = vld [vmem:[%s1918_s5 + $0x10] sm:$0xff] }
  0xd2   : > { %v1191_v27 = vpack.c.bf16 %v796_v24, %v794_v23  ;;  %v826_v12 = vld [vmem:[#allocation10 + $0x1e0] sm:$0xff] }
  0xd4   : > { %1112 = vmatpush1.bf16.xpose.msra.mxu0 %v1111_v29  ;;  %v532_v29 = vld [vmem:[#allocation8 + $0x1a8] sm:$0xff] }
  0xd5   : > { %1114 = vmatprep.subr.bf16.mxu0 %v1113_v30  ;;  %v534_v30 = vld [vmem:[#allocation8 + $0x1b8] sm:$0xff] }
  0xd6   : > { %v1149_v33 = vpack.c.bf16 %v534_v30, %v532_v29  ;;  %v798_v29 = vld [vmem:[#allocation10 + $0x100] sm:$0xff]  ;;  %v800_v30 = vld [vmem:[#allocation10 + $0x110] sm:$0xff] }
  0xdc   : > { %1116 = vmatpush1.bf16.xpose.msra.mxu0 %v1115_v35  ;;  %v772_v35 = vld [vmem:[#allocation10 + $0x30] sm:$0xff] }
  0xdd   : > { %1118 = vmatprep.subr.bf16.mxu0 %v1117_v36  ;;  %v775_v36 = vld [vmem:[#allocation10 + $0x48] sm:$0xff]  ;;  %v1167_v40 = vpack.c.bf16 %v772_v35, %v770_v34  ;;  %v802_v35 = vld [vmem:[#allocation10 + $0x120] sm:$0xff] }
  0xde   : > { %v1169_v43 = vpack.c.bf16 %v777_v37, %v775_v36  ;;  %v804_v36 = vld [vmem:[#allocation10 + $0x130] sm:$0xff]  ;;  %v807_v37 = vld [vmem:[#allocation10 + $0x148] sm:$0xff] }
  0xdf   : > { %1168 = vmatpush1.bf16.xpose.msra.mxu1 %v1167_v40  ;;  %v1199_v39 = vpack.c.bf16 %v804_v36, %v802_v35  ;;  %v1201_v40 = vpack.c.bf16 %v809_v38, %v807_v37 }
  0xe0   : > { %1170 = vmatprep.subr.bf16.mxu1 %v1169_v43  ;;  %v811_v43 = vld [vmem:[#allocation10 + $0x168] sm:$0xff] }
  0xe4   : > { %1120 = vmatpush1.bf16.xpose.msra.mxu0 %v1119_v41  ;;  %v536_v41 = vld [vmem:[#allocation8 + $0x1c8] sm:$0xff] }
  0xe5   : > { %1122 = vmatprep.subr.bf16.mxu0 %v1121_v42  ;;  %v538_v42 = vld [vmem:[#allocation8 + $0x1d8] sm:$0xff] }
  0xe6   : > { %v1153_v45 = vpack.c.bf16 %v538_v42, %v536_v41  ;;  %v806_v41 = vld [vmem:[#allocation10 + $0x140] sm:$0xff]  ;;  %v808_v42 = vld [vmem:[#allocation10 + $0x150] sm:$0xff] }
  0xec   : > { %1124 = vmatpush1.bf16.xpose.msra.mxu0 %v1123_v47  ;;  %v776_v47 = vld [vmem:[#allocation10 + $0x50] sm:$0xff] }
  0xed   : > { %1126 = vmatprep.subr.bf16.mxu0 %v1125_v48  ;;  %v779_v48 = vld [vmem:[#allocation10 + $0x68] sm:$0xff]  ;;  %v1171_v52 = vpack.c.bf16 %v776_v47, %v774_v46  ;;  %v810_v47 = vld [vmem:[#allocation10 + $0x160] sm:$0xff] }
  0xee   : > { %v1173_v55 = vpack.c.bf16 %v781_v49, %v779_v48  ;;  %v812_v48 = vld [vmem:[#allocation10 + $0x170] sm:$0xff]  ;;  %v815_v49 = vld [vmem:[#allocation10 + $0x188] sm:$0xff] }
  0xef   : > { %1172 = vmatpush1.bf16.xpose.msra.mxu1 %v1171_v52  ;;  %v1207_v51 = vpack.c.bf16 %v812_v48, %v810_v47  ;;  %v1209_v52 = vpack.c.bf16 %v817_v50, %v815_v49 }
  0xf0   : > { %1174 = vmatprep.subr.bf16.mxu1 %v1173_v55  ;;  %v819_v55 = vld [vmem:[#allocation10 + $0x1a8] sm:$0xff] }
  0xf4   : > { %1128 = vmatpush1.bf16.xpose.msra.mxu0 %v1127_v53  ;;  %v540_v53 = vld [vmem:[#allocation8 + $0x1e8] sm:$0xff] }
  0xf5   : > { %1130 = vmatprep.subr.bf16.mxu0 %v1129_v54  ;;  %v542_v54 = vld [vmem:[#allocation8 + $0x1f8] sm:$0xff] }
  0xf6   : > { %v1157_v57 = vpack.c.bf16 %v542_v54, %v540_v53  ;;  %v814_v53 = vld [vmem:[#allocation10 + $0x180] sm:$0xff]  ;;  %v816_v54 = vld [vmem:[#allocation10 + $0x190] sm:$0xff] }
  0xfc   : > { %1132 = vmatpush1.bf16.xpose.msra.mxu0 %v1131_v59  ;;  %v780_v59 = vld [vmem:[#allocation10 + $0x70] sm:$0xff] }
  0xfd   : > { %1134 = vmatprep.subr.bf16.mxu0 %v1133_v60  ;;  %v783_v60 = vld [vmem:[#allocation10 + $0x88] sm:$0xff]  ;;  %v1175_v1 = vpack.c.bf16 %v780_v59, %v778_v58  ;;  %v818_v59 = vld [vmem:[#allocation10 + $0x1a0] sm:$0xff] }
  0xff   : > { %1176 = vmatpush1.bf16.xpose.msra.mxu1 %v1175_v1 }
 0x104   : > { %1136 = vmatpush1.bf16.xpose.msra.mxu0 %v1135_v2  ;;  %v1177_v2 = vpack.c.bf16 %v785_v61, %v783_v60  ;;  %v820_v60 = vld [vmem:[#allocation10 + $0x1b0] sm:$0xff]  ;;  %v823_v61 = vld [vmem:[#allocation10 + $0x1c8] sm:$0xff] }
 0x105   : > { %1138 = vmatprep.subr.bf16.mxu0 %v1137_v3  ;;  %v1159_v3 = vpack.c.bf16 %v541_v63, %v539_v62  ;;  %v825_v62 = vld [vmem:[#allocation10 + $0x1d8] sm:$0xff]  ;;  %v1215_v63 = vpack.c.bf16 %v820_v60, %v818_v59 }
 0x106   : > { %1178 = vmatprep.subr.bf16.mxu1 %v1177_v2  ;;  %v1217_v1 = vpack.c.bf16 %v825_v62, %v823_v61  ;;  %v822_v2 = vld [vmem:[#allocation10 + $0x1c0] sm:$0xff] }
 0x10c   : > { %1140 = vmatpush1.bf16.xpose.msra.mxu0 %v1139_v8  ;;  %v789_v8 = vld [vmem:[#allocation10 + $0xb8] sm:$0xff] }
 0x10d   : > { %1142 = vmatprep.subr.bf16.mxu0 %v1141_v9  ;;  %v1179_v9 = vpack.c.bf16 %v784_v6, %v782_v5  ;;  %v1181_v10 = vpack.c.bf16 %v789_v8, %v787_v7  ;;  %v829_v5 = vld [vmem:[#allocation10 + $0x1f8] sm:$0xff] }
 0x10f   : > { %1180 = vmatpush1.bf16.xpose.msra.mxu1 %v1179_v9 }
 0x110   : > { %1182 = vmatprep.subr.bf16.mxu1 %v1181_v10  ;;  %v688_v10 = vld [vmem:[%s348_s27] sm:$0xff]  ;;  %s1463_s27 = scalar_lea.vmem %s1462_s1, 512 }
 0x111   : > { %p1465_p4 = scmp.lt.s32.totalorder %s1463_s27, %s1457_s11 }
 0x113   : > { %p1466_p13 = por %p1465_p4, %p1464_p11 }
 0x114   : > { %1144 = vmatpush1.bf16.xpose.msra.mxu0 %v1143_v14  ;;  %v793_v14 = vld [vmem:[#allocation10 + $0xd8] sm:$0xff] }
 0x115   : > { %1146 = vmatprep.subr.bf16.mxu0 %v1145_v18  ;;  %v1185_v16 = vpack.c.bf16 %v793_v14, %v791_v13  ;;  %v792_v18 = vld [vmem:[#allocation10 + $0xd0] sm:$0xff]  ;;  %p1467_p2 = pnand %p1466_p13, %p1460_p9 }
 0x116   : > { %v1187_v21 = vpack.c.bf16 %v792_v18, %v790_v17  ;;  %v828_v13 = vld [vmem:[#allocation10 + $0x1f0] sm:$0xff] }
 0x117   : > { %1184 = vmatpush1.bf16.xpose.msra.mxu1 %v1183_v15  ;;  %v1223_v14 = vpack.c.bf16 %v828_v13, %v826_v12  ;;  %v903_v15 = vld [vmem:[%s1919_s6] sm:$0xff] }
 0x118   : > { %1186 = vmatprep.subr.bf16.mxu1 %v1185_v16  ;;  %v1541_v16 = vmov 0  }
 0x119   : > { %1310 = vset.pattern.permute.xlu0 %v1541_v16 }
 0x11a   : > { %906 = vperm.xlu0 %1310, %v903_v15  }
 0x11c   : > { %1148 = vmatpush1.bf16.xpose.msra.mxu0 %v1147_v32  ;;  %v805_v32 = vld [vmem:[#allocation10 + $0x138] sm:$0xff] }
 0x11d   : > { %1150 = vmatprep.subr.bf16.mxu0 %v1149_v33  ;;  %v1195_v33 = vpack.c.bf16 %v800_v30, %v798_v29  ;;  %v1197_v34 = vpack.c.bf16 %v805_v32, %v803_v31 }
 0x11f   : > { %1188 = vmatpush1.bf16.xpose.msra.mxu1 %v1187_v21 }
 0x120   : > { %1190 = vmatprep.subr.bf16.mxu1 %v1189_v22 }
 0x124   : > { %1152 = vmatpush1.bf16.xpose.msra.mxu0 %v1151_v44  ;;  %v813_v44 = vld [vmem:[#allocation10 + $0x178] sm:$0xff] }
 0x125   : > { %1154 = vmatprep.subr.bf16.mxu0 %v1153_v45  ;;  %v1203_v45 = vpack.c.bf16 %v808_v42, %v806_v41  ;;  %v1205_v46 = vpack.c.bf16 %v813_v44, %v811_v43 }
 0x127   : > { %1192 = vmatpush1.bf16.xpose.msra.mxu1 %v1191_v27 }
 0x128   : > { %1194 = vmatprep.subr.bf16.mxu1 %v1193_v28 }
 0x12c   : > { %1156 = vmatpush1.bf16.xpose.msra.mxu0 %v1155_v56  ;;  %v821_v56 = vld [vmem:[#allocation10 + $0x1b8] sm:$0xff] }
 0x12d   : > { %1158 = vmatprep.subr.bf16.mxu0 %v1157_v57  ;;  %v1211_v57 = vpack.c.bf16 %v816_v54, %v814_v53  ;;  %v1213_v58 = vpack.c.bf16 %v821_v56, %v819_v55 }
 0x12f   : > { %1196 = vmatpush1.bf16.xpose.msra.mxu1 %v1195_v33 }
 0x130   : > { %1198 = vmatprep.subr.bf16.mxu1 %v1197_v34 }
 0x134   : > { %1160 = vmatpush1.bf16.xpose.msra.mxu0 %v1159_v3  ;;  %v824_v3 = vld [vmem:[#allocation10 + $0x1d0] sm:$0xff] }
 0x135   : > { %695 = vmatprep.subr.mxu0 %v689_v4  ;;  %v827_v4 = vld [vmem:[#allocation10 + $0x1e8] sm:$0xff]  ;;  %v1219_v6 = vpack.c.bf16 %v824_v3, %v822_v2 }
 0x136   : > { %v1221_v7 = vpack.c.bf16 %v829_v5, %v827_v4 }
 0x137   : > { %1200 = vmatpush1.bf16.xpose.msra.mxu1 %v1199_v39 }
 0x138   : > { %1202 = vmatprep.subr.bf16.mxu1 %v1201_v40 }
 0x13f   : > { %1204 = vmatpush1.bf16.xpose.msra.mxu1 %v1203_v45 }
 0x140   : > { %1206 = vmatprep.subr.bf16.mxu1 %v1205_v46 }
 0x147   : > { %1208 = vmatpush1.bf16.xpose.msra.mxu1 %v1207_v51 }
 0x148   : > { %1210 = vmatprep.subr.bf16.mxu1 %v1209_v52 }
 0x14f   : > { %1212 = vmatpush1.bf16.xpose.msra.mxu1 %v1211_v57 }
 0x150   : > { %1214 = vmatprep.subr.bf16.mxu1 %v1213_v58 }
 0x157   : > { %1216 = vmatpush1.bf16.xpose.msra.mxu1 %v1215_v63 }
 0x158   : > { %1218 = vmatprep.subr.bf16.mxu1 %v1217_v1 }
 0x15f   : > { %1220 = vmatpush1.bf16.xpose.msra.mxu1 %v1219_v6 }
 0x160   : > { %1222 = vmatprep.subr.bf16.mxu1 %v1221_v7 }
 0x167   : > { %1224 = vmatpush1.bf16.xpose.msra.mxu1 %v1223_v14 }
 0x189   : > { %v474_v8 = vpop.f32.mrb[0].mxu0 }
 0x18a   : > { %v476_v9 = vpop.f32.mrb[1].mxu0 }
 0x18b   : > { %607 = vmatprep.mubr.f32.mxu0 %v476_v9 }
 0x18c   : > { %608 = vmatmul.mubr.f32.vlgmr.msra.gmra.mrb[2].mxu0 %v474_v8 }
 0x18d   : > { %696 = vmatpush1.msra.mxu0 %v688_v10  ;;  %759 = vmatprep.mubr.f32.mxu0 %v1540_v0 }
 0x190   : > { %1087 = vmatmul.mubr.msk.f32.vlgmr.msra.gmra.mrb[4].mxu0 %vm404_vm0, %v1086_v11 }
 0x199   : > { %v907_v21 = vpop.permute.xlu0 %906 }
 0x25f   : > { %v609_v0 = vpop.f32.mrb[2].mxu0 }
 0x260   : > { %v611_v17 = vpop.f32.mrb[3].mxu0 }
 0x263   : > { %v761_v18 = vpop.f32.mrb[4].mxu0 }
 0x264   : > { %v763_v19 = vpop.f32.mrb[5].mxu0 }
 0x265   : > { %894 = vmatprep.mubr.f32.mxu1 %v763_v19 }
 0x266   : > { %895 = vmatmul.mubr.f32.vlgmr.msra.gmra.mrb[0].mxu1 %v761_v18 }
 0x339   : > { %v896_v20 = vpop.f32.mrb[0].mxu1 }
 0x33a   : > { %v1225_v22 = vadd.f32 %v896_v20, %v609_v0  ;;  %v898_v23 = vpop.f32.mrb[1].mxu1 }
 0x33b   : > { %v1226_v24 = vadd.f32 %v898_v23, %v611_v17 }
 0x33c   : > { %v909_v25 = vadd.f32 %v1225_v22, %v907_v21 }
 0x33d   : > { %v910_v26 = vadd.f32 %v1226_v24, %v907_v21 }
 0x33e   : > { %v911_v27 = vmax.f32 %v909_v25, 0.0 }
 0x33f   : > { %v912_v28 = vmax.f32 %v910_v26, 0.0 }
 0x340   : > { %913 = vst [vmem:[%s396_s18] sm:$0xff] %v911_v27 }
 0x341   : > { %914 = vst [vmem:[%s396_s18 + $0x8] sm:$0xff] %v912_v28 }
 0x342   : > { %1470 = shalt.err (!%p1467_p2)
}
 0x343   : > { %s1471_s3 = scalar_lea.hbm %s1869_s9, 256  ;;  %s1475_s30 = scalar_lea.hbm %s1920_s7, 512 }
 0x344   : > { %p1472_p5 = scmp.ne.s32.totalorder %s1869_s9, %s1471_s3  ;;  %p1476_p0 = scmp.lt.u32.totalorder %s1869_s9, %s1920_s7 }
 0x345   : > { %p1477_p7 = scmp.lt.u32.totalorder %s1475_s30, %s1471_s3  ;;  %p1479_p6 = scmp.lt.u32.totalorder %s1471_s3, %s1869_s9 }
 0x346   : > { %p1473_p12 = pnand %p1472_p5, %p1966_p10 }
 0x347   : > { %p1478_p1 = por %p1477_p7, %p1476_p0 }
 0x348   : > { %p1474_p3 = pneg %p1473_p12 }
 0x349   : > { %p1480_p8 = por %p1479_p6, %p1478_p1 }
 0x34b   : > { %p1481_p9 = pnand %p1480_p8, %p1474_p3 }
 0x34d   : > { %1484 = shalt.err (!%p1481_p9)
}
 0x34e   : > { %1243 = dma.vmem_to_hbm [thread:$0]  (%p1966_p10), %s1871_s16, 256, %s1869_s9, %s916_s20  }
 0x34f PF: > { %s1967_s14 = sld [smem:[#allocation16_spill]]  ;;  %s942_s29 = sand.u32 1, %s1519_s24  }
 0x350   : > { %p1968_p11 = scmp.ne.s32.totalorder %s1942_s8, 0  ;;  %s943_s21 = scalar_lea.sflag [#allocation4], %s942_s29 }
 0x355   : > { %p1969_p4 = scmp.ge.s32.totalorder %s1967_s14, 2 }
 0x357   : > { %p1263_p13 = pnand %p1969_p4, %p1968_p11 }
 0x359   : > { %1514 = dma.done.wait (!%p1263_p13), %s943_s21, 256  }
 0x35a   : > { %1516 = vsyncadd (!%p1263_p13), %s943_s21, 4294967040  ;;  %s1970_s27 = sld [smem:[#allocation17_spill]]  ;;  %s1971_s22 = sld [smem:[#allocation18_spill]] }
 0x35b   : > { %s1972_s24 = smov %s1523_s25  ;;  %s1973_s25 = smov %s1527_s26 }
 0x360   : > { %p24_p2 = scmp.ge.s32.totalorder %s1970_s27, 4   ;;  %s1974_s26 = smov %s1971_s22 }
 0x362   :  { %26 = sbr.rel (!%p24_p2) target bundleno = 11 (0xb), region = 127 }
 0x369   :  { %948 = vsyncpa [#allocation3], 1 }
 0x36a   :  { %950 = vsyncpa [#allocation3 + $0x1], 1 }
 0x36b   :  { %951 = vsyncpa [#allocation6], 1 }
 0x36c   :  { %953 = vsyncpa [#allocation6 + $0x1], 1 }
 0x36d   :  { %954 = vsyncpa [#allocation9], 1 }
 0x36e   :  { %955 = vsyncpa [#allocation4], 1 }
 0x36f   :  { %957 = vsyncpa [#allocation4 + $0x1], 1 }

</bundles_post_ra>
